<compile_context>
chip_gen: v7x
topology: tpu7x:2x2x1
jax: 0.10.0
libtpu: 0.0.40
codegen_flags: <defaults>
</compile_context>

<pallas_src>
import jax
import jax.numpy as jnp
from jax.experimental import pallas as pl
from jax.experimental.pallas import tpu as pltpu


def _fbn_kernel(x_ref, scale_ref, bias_ref, o_ref):
    """One (TR, TM) tile of y = x * scale + bias.

    scale_ref / bias_ref are either (TR, 1) (broadcast along lanes) or
    (1, TM) (broadcast along sublanes); jnp broadcasting handles both.
    """
    o_ref[...] = (x_ref[...] * scale_ref[...] + bias_ref[...]).astype(o_ref.dtype)


def _round_down(x, m):
    return (x // m) * m


def _vmem_capacity_bytes():
    try:
        return int(pltpu.get_tpu_info().vmem_capacity_bytes)
    except Exception:
        return 64 * 1024 * 1024  # conservative: v7x per-TensorCore VMEM


def frozen_batch_norm_2d(x, weight, bias, running_mean, running_var, eps=1e-5):
    """x: (N, C, H, W); params: (C,). Returns (N, C, H, W) with x.dtype."""
    N, C, H, W = x.shape
    HW = H * W
    itemsize = jnp.dtype(x.dtype).itemsize
    sublane = max(8, 32 // max(itemsize, 1))  # f32: 8, bf16: 16, int8/fp8: 32

    # Fused per-channel affine params, computed in f32 (C elements -> trivial).
    scale_c = weight.astype(jnp.float32) * jax.lax.rsqrt(
        running_var.astype(jnp.float32) + jnp.float32(eps))
    bias_c = bias.astype(jnp.float32) - running_mean.astype(jnp.float32) * scale_c

    # Generation-aware budgets (v5e/v6e: 128 MiB VMEM, v7x: 64 MiB per TC).
    vmem_cap = _vmem_capacity_bytes()
    vmem_limit = int(min(vmem_cap - vmem_cap // 4, 64 * 1024 * 1024))
    tile_budget = max(min(vmem_limit // 8, 8 * 1024 * 1024), 2 * 1024 * 1024)

    if HW % 128 == 0:
        # Layout A: rows = N*C, lanes = H*W (already lane-dense). Per-row params.
        R, M = N * C, HW
        x2d = x.reshape(R, M)                       # free reshape for row-major NCHW
        scale2d = jnp.tile(scale_c, (N,)).reshape(R, 1)
        bias2d = jnp.tile(bias_c, (N,)).reshape(R, 1)

        TM = min(M, 2048)                           # multiple of 128 (M is)
        rows_fit = max(tile_budget // (TM * itemsize), sublane)
        if rows_fit >= R:
            TR = R                                  # full-extent block is allowed
        else:
            TR = max(_round_down(min(rows_fit, 1024), sublane), sublane)

        scale_spec = pl.BlockSpec((TR, 1), lambda i, j: (i, 0))
        bias_spec = pl.BlockSpec((TR, 1), lambda i, j: (i, 0))
    else:
        # Layout B: rows = N, lanes = C*H*W (lane-dense even for 7x7 / 14x14 maps).
        # Per-lane params: scale_c[c] repeated H*W times along the lane axis.
        R, M = N, C * HW
        x2d = x.reshape(R, M)                       # free reshape for row-major NCHW
        scale2d = jnp.repeat(scale_c, HW).reshape(1, M)
        bias2d = jnp.repeat(bias_c, HW).reshape(1, M)

        TR = R if R <= 4 * sublane else _round_down(min(R, 256), sublane)
        lanes_fit = max(tile_budget // (TR * itemsize), 128)
        if M % 128 == 0:
            TM = max(min(_round_down(lanes_fit, 128), M), 128)
        elif TR * M * itemsize <= tile_budget or M < 128:
            TM = M                                  # full-extent lane block
        else:
            TM = max(_round_down(lanes_fit, 128), 128)

        scale_spec = pl.BlockSpec((1, TM), lambda i, j: (0, j))
        bias_spec = pl.BlockSpec((1, TM), lambda i, j: (0, j))

    # Give both v7x TensorCores work if a single tile would cover a large array.
    if pl.cdiv(R, TR) * pl.cdiv(M, TM) == 1 and R * M * itemsize > (1 << 20):
        if TM % 256 == 0:
            TM //= 2
        elif TR % (2 * sublane) == 0:
            TR //= 2

    grid = (pl.cdiv(R, TR), pl.cdiv(M, TM))

    out2d = pl.pallas_call(
        _fbn_kernel,
        out_shape=jax.ShapeDtypeStruct((R, M), x.dtype),
        grid=grid,
        in_specs=[
            pl.BlockSpec((TR, TM), lambda i, j: (i, j)),
            scale_spec,
            bias_spec,
        ],
        out_specs=pl.BlockSpec((TR, TM), lambda i, j: (i, j)),
        compiler_params=pltpu.CompilerParams(
            dimension_semantics=("parallel", "parallel"),
            vmem_limit_bytes=vmem_limit,
        ),
    )(x2d, scale2d, bias2d)

    return out2d.reshape(N, C, H, W)


def frozen_batch_norm_2d_ref(x, weight, bias, running_mean, running_var):
    """Pure-JAX reference matching the PyTorch forward exactly."""
    w = weight.reshape(1, -1, 1, 1)
    b = bias.reshape(1, -1, 1, 1)
    rv = running_var.reshape(1, -1, 1, 1)
    rm = running_mean.reshape(1, -1, 1, 1)
    eps = 1e-05
    scale = w * jax.lax.rsqrt(rv + eps)
    bias_ = b - rm * scale
    return x * scale + bias_


if __name__ == "__main__":
    key = jax.random.PRNGKey(0)
    kx, kw, kb, km, kv, kx2 = jax.random.split(key, 6)

    N, C, H, W = 2, 4, 16, 16
    x = jax.random.normal(kx, (N, C, H, W), dtype=jnp.float32)

    # Module defaults are weight=1, bias=0, mean=0, var=1; perturb deterministically.
    weight = jnp.ones((C,), jnp.float32) + 0.1 * jax.random.normal(kw, (C,))
    bias = jnp.zeros((C,), jnp.float32) + 0.1 * jax.random.normal(kb, (C,))
    running_mean = jnp.zeros((C,), jnp.float32) + 0.1 * jax.random.normal(km, (C,))
    running_var = jnp.ones((C,), jnp.float32) + 0.1 * jnp.abs(jax.random.normal(kv, (C,)))

    # Layout A path (H*W = 256, multiple of 128), f32.
    out = jax.block_until_ready(
        frozen_batch_norm_2d(x, weight, bias, running_mean, running_var))
    ref = frozen_batch_norm_2d_ref(x, weight, bias, running_mean, running_var)
    assert out.shape == (N, C, H, W)
    assert jnp.allclose(out, ref, atol=1e-5, rtol=1e-5), "f32 layout-A mismatch"

    # Layout B path (H*W = 49 -> lane axis flattened to C*H*W), f32.
    x_small = jax.random.normal(kx2, (N, C, 7, 7), dtype=jnp.float32)
    out_b = jax.block_until_ready(
        frozen_batch_norm_2d(x_small, weight, bias, running_mean, running_var))
    ref_b = frozen_batch_norm_2d_ref(x_small, weight, bias, running_mean, running_var)
    assert jnp.allclose(out_b, ref_b, atol=1e-5, rtol=1e-5), "f32 layout-B mismatch"

    # bf16 activations: bf16 HBM traffic, f32 math in-kernel, bf16 output.
    x_bf16 = x.astype(jnp.bfloat16)
    out_bf = jax.block_until_ready(
        frozen_batch_norm_2d(x_bf16, weight, bias, running_mean, running_var))
    ref_bf = frozen_batch_norm_2d_ref(
        x_bf16.astype(jnp.float32), weight, bias, running_mean, running_var)
    assert out_bf.dtype == jnp.bfloat16
    assert jnp.allclose(out_bf.astype(jnp.float32), ref_bf, atol=5e-2, rtol=5e-2), \
        "bf16 mismatch"

    print("KERNEL_OK")
</pallas_src>

<mosaic_0001>
module attributes {stable_mosaic.version = 11 : i64} {
  func.func @_fbn_kernel(%arg0: i32, %arg1: i32, %arg2: memref<8x256xf32, #tpu.memory_space<vmem>>, %arg3: memref<8x1xf32, #tpu.memory_space<vmem>>, %arg4: memref<8x1xf32, #tpu.memory_space<vmem>>, %arg5: memref<8x256xf32, #tpu.memory_space<vmem>>) attributes {dimension_semantics = [#tpu.dimension_semantics<parallel>, #tpu.dimension_semantics<parallel>], iteration_bounds = array<i64: 1, 1>, scalar_prefetch = 0 : i64, scratch_operands = 0 : i64, tpu.core_type = #tpu.core_type<tc>, window_params = [{transform_indices = @transform_0, window_bounds = array<i64: 8, 256>}, {transform_indices = @transform_1, window_bounds = array<i64: 8, 1>}, {transform_indices = @transform_2, window_bounds = array<i64: 8, 1>}, {transform_indices = @transform_3, window_bounds = array<i64: 8, 256>}]} {
    %c0 = arith.constant 0 : index
    %c0_0 = arith.constant 0 : index
    %0 = vector.load %arg2[%c0, %c0_0] : memref<8x256xf32, #tpu.memory_space<vmem>>, vector<8x256xf32>
    %c0_1 = arith.constant 0 : index
    %c0_2 = arith.constant 0 : index
    %1 = vector.load %arg3[%c0_1, %c0_2] : memref<8x1xf32, #tpu.memory_space<vmem>>, vector<8x1xf32>
    %2 = vector.broadcast %1 : vector<8x1xf32> to vector<8x256xf32>
    %3 = arith.mulf %0, %2 : vector<8x256xf32>
    %c0_3 = arith.constant 0 : index
    %c0_4 = arith.constant 0 : index
    %4 = vector.load %arg4[%c0_3, %c0_4] : memref<8x1xf32, #tpu.memory_space<vmem>>, vector<8x1xf32>
    %5 = vector.broadcast %4 : vector<8x1xf32> to vector<8x256xf32>
    %6 = arith.addf %3, %5 : vector<8x256xf32>
    %c0_5 = arith.constant 0 : index
    %c0_6 = arith.constant 0 : index
    %7 = vector.load %arg5[%c0_5, %c0_6] : memref<8x256xf32, #tpu.memory_space<vmem>>, vector<8x256xf32>
    tpu.vector_store %arg5[%c0_5, %c0_6], %6 {strides = array<i32>} : memref<8x256xf32, #tpu.memory_space<vmem>>, vector<8x256xf32>,
    return
  }
  func.func @transform_0(%arg0: i32, %arg1: i32) -> (i32, i32) {
    %c0_i32 = arith.constant 0 : i32
    return %arg0, %arg1 : i32, i32
  }
  func.func @transform_1(%arg0: i32, %arg1: i32) -> (i32, i32) {
    %c0_i32 = arith.constant 0 : i32
    %c0_i32_0 = arith.constant 0 : i32
    return %arg0, %c0_i32 : i32, i32
  }
  func.func @transform_2(%arg0: i32, %arg1: i32) -> (i32, i32) {
    %c0_i32 = arith.constant 0 : i32
    %c0_i32_0 = arith.constant 0 : i32
    return %arg0, %c0_i32 : i32, i32
  }
  func.func @transform_3(%arg0: i32, %arg1: i32) -> (i32, i32) {
    %c0_i32 = arith.constant 0 : i32
    return %arg0, %arg1 : i32, i32
  }
}

</mosaic_0001>

<bundles_post_ra>
// kernel: tpu_custom_call.1
= control target key start
LH: loop header
LB: loop body
LE: loop exit
PB: predicated region body
PF: predicated region fallthrough
CT: control target
= control target key end

     0   :  { %s122_s0 = inlined_call_operand.vmem [shape: f32[8,256], index: 0, kind: input, shape index: {}]   ;;  %s123_s1 = inlined_call_operand.vmem [shape: f32[8,1], index: 1, kind: input, shape index: {}]   ;;  %s124_s2 = inlined_call_operand.vmem [shape: f32[8,1], index: 2, kind: input, shape index: {}]   ;;  %s125_s3 = inlined_call_operand.hbm [shape: f32[8,256], index: 3, kind: output, shape index: {}]  }
   0x1   :  { %v17_v0 = vld [vmem:[%s123_s1] sm:$0xff] }
   0x2   :  { %8 = vsyncpa [#allocation3], 0  ;;  %v76_v1 = vmov 0   ;;  %v25_v2 = vld [vmem:[%s124_s2] sm:$0xff]  ;;  %v16_v5 = vld [vmem:[%s122_s0 + $0x8] sm:$0xff]  ;;  %s77_s20 = smov [#allocation2]  }
   0x3   :  { %51 = vset.pattern.permute.xlu0 %v76_v1  ;;  %v15_v4 = vld [vmem:[%s122_s0] sm:$0xff]  ;;  %s41_s1 = sshll.u32 %s77_s20, 4  ;;  %s42_s1 = int_to_ptr.vmem [resolvable:$true] %s41_s1 }
   0x4   :  { %20 = vperm.xlu0 %51, %v17_v0   ;;  %s52_s2 = scalar_lea.vmem %s42_s1, 256  ;;  %p57_p1 = scmp.lt.s32.totalorder %s42_s1, %s42_s1 }
   0x5   :  { %p53_p0 = scmp.ne.s32.totalorder %s42_s1, %s52_s2  ;;  %p58_p2 = scmp.lt.s32.totalorder %s52_s2, %s52_s2 }
   0x7   :  { %p59_p3 = por %p58_p2, %p57_p1 }
   0x8   :  { %28 = vperm.xlu0 %51, %v25_v2  }
   0x9   :  { %p60_p4 = pnand %p59_p3, %p53_p0 }
  0x83   :  { %v21_v3 = vpop.permute.xlu0 %20 }
  0x84   :  { %v23_v6 = vmul.f32 %v21_v3, %v15_v4  ;;  %v24_v7 = vmul.f32 %v21_v3, %v16_v5 }
  0x87   :  { %v29_v8 = vpop.permute.xlu0 %28 }
  0x88   :  { %v31_v9 = vadd.f32 %v29_v8, %v23_v6  ;;  %v32_v10 = vadd.f32 %v29_v8, %v24_v7 }
  0x8a   :  { %33 = vst [vmem:[#allocation2] sm:$0xff] %v31_v9  ;;  %34 = vst [vmem:[#allocation2 + $0x8] sm:$0xff] %v32_v10 }
  0x8b   :  { %63 = shalt.err (!%p60_p4)
}
  0x8c   :  { %s64_s0 = scalar_lea.hbm %s125_s3, 256 }
  0x8d   :  { %p65_p5 = scmp.ne.s32.totalorder %s125_s3, %s64_s0  ;;  %p68_p6 = scmp.lt.u32.totalorder %s64_s0, %s125_s3 }
  0x8f   :  { %p70_p7 = pnand %p68_p6, %p65_p5 }
  0x91   :  { %73 = shalt.err (!%p70_p7)
}
  0x92   :  { %44 = dma.vmem_to_hbm [thread:$0]  %s42_s1, 256, %s125_s3, [#allocation3]  }
  0x93   :  { %74 = dma.done.wait [#allocation3], 256  }
  0x94   :  { %75 = vsyncadd [#allocation3], 4294967040 }
  0x95   :  { %48 = vsyncpa [#allocation3], 1 }

</bundles_post_ra>
